<compile_context>
chip_gen: v5e
topology: v5e:2x2
jax: 0.10.0
libtpu: 0.0.40
codegen_flags: <defaults>
</compile_context>

<pallas_src>
import functools

import jax
import jax.numpy as jnp
import numpy as np
from jax.experimental import pallas as pl
from jax.experimental.pallas import tpu as pltpu


def _round_up(x, m):
    return ((x + m - 1) // m) * m


@functools.partial(jax.jit,
                   static_argnames=("stride", "padding", "eps", "compute_dtype"))
def relu_conv_bn(x_nchw, conv_w, gamma, beta, *, stride, padding, eps=1e-5,
                 compute_dtype=jnp.bfloat16):
    """Forward of ReLUConvBN. x_nchw: (N, C_in, H, W); conv_w: (C_out, C_in, KH, KW)."""
    N, C_in, H, W = x_nchw.shape
    C_out, _, KH, KW = conv_w.shape
    Ho = (H + 2 * padding - KH) // stride + 1
    Wo = (W + 2 * padding - KW) // stride + 1
    HoWo = Ho * Wo
    K = C_in * KH * KW

    cdt = jnp.dtype(compute_dtype)
    itemsize = cdt.itemsize
    SUB = 16 if itemsize == 2 else 8          # sublane granule of the compute dtype
    Kp = _round_up(K, SUB)                    # contraction dim (sublane axis of patches^T)
    Cp_w = _round_up(C_out, SUB)              # weight rows (matmul LHS sublanes)
    Cp_o = _round_up(C_out, 8)                # f32 output / stats rows

    # Pixel (lane) tile: as large as possible while the double-buffered patch tile
    # stays within a ~4 MiB budget (keeps v5e's 16 MiB scoped default safe too).
    tm_cap = max(128, (((4 << 20) // max(2 * Kp * itemsize, 1)) // 128) * 128)
    tm = min(_round_up(HoWo, 128), tm_cap, 2048)
    HoWop = _round_up(HoWo, tm)
    n_m = HoWop // tm

    # ---- wrapper-side im2col (transposed, built directly at padded shape, bf16) ----
    x_c = x_nchw.astype(cdt)                  # cast first: halves im2col HBM bytes
    xp = jnp.pad(x_c, ((0, 0), (0, 0), (padding, padding), (padding, padding)))
    taps = []
    for i in range(KH):
        for j in range(KW):
            t = xp[:, :, i:i + stride * Ho:stride, j:j + stride * Wo:stride]
            taps.append(t.reshape(N, C_in, HoWo))          # (N, C_in, Ho*Wo)
    if Kp > K:                                 # fold K padding into the concat itself
        taps.append(jnp.zeros((N, Kp - K, HoWo), cdt))
    patches_t = jnp.concatenate(taps, axis=1)              # (N, Kp, Ho*Wo)
    if HoWop > HoWo:                           # usually a no-op (HoWo multiple of tm)
        patches_t = jnp.pad(patches_t, ((0, 0), (0, 0), (0, HoWop - HoWo)))

    # weights: (C_out, C_in, KH, KW) -> (C_out, KH, KW, C_in) -> (C_out, K);
    # k = (i*KW + j)*C_in + c, matching the patch concat order above.
    w_t = jnp.transpose(conv_w, (0, 2, 3, 1)).reshape(C_out, K).astype(cdt)
    w_t = jnp.pad(w_t, ((0, Cp_w - C_out), (0, Kp - K)))

    gamma_c = jnp.pad(gamma.astype(jnp.float32), (0, Cp_o - C_out)).reshape(Cp_o, 1)
    beta_c = jnp.pad(beta.astype(jnp.float32), (0, Cp_o - C_out)).reshape(Cp_o, 1)

    # ---- VMEM budgeting: z stash vs. recompute fallback, explicit vmem limit ----
    try:
        vmem_cap = int(pltpu.get_tpu_info().vmem_capacity_bytes)
    except Exception:                           # conservative default (v7x-sized)
        vmem_cap = 64 * 1024 * 1024
    patch_blk = Kp * tm * itemsize
    out_blk = Cp_o * tm * 4
    stash_bytes = N * n_m * Cp_o * tm * 4
    pipeline_bytes = 2 * patch_blk + 2 * out_blk + 2 * Cp_w * Kp * itemsize + (256 << 10)
    use_stash = (pipeline_bytes + stash_bytes) <= int(0.45 * vmem_cap)
    vmem_limit = int(min(int(0.9 * vmem_cap),
                         max(32 << 20,
                             pipeline_bytes
                             + (stash_bytes if use_stash else 0) + (8 << 20))))

    inv_m = 1.0 / float(N * HoWo)               # true element count (excludes padding)
    eps_f = float(eps)

    # ------------------------------- fused kernel -------------------------------
    def kernel(p_ref, w_ref, g_ref, b_ref, o_ref, *scratch):
        sum_ref, sq_ref, scale_ref, shift_ref = scratch[:4]
        z_stash = scratch[4] if use_stash else None

        p = pl.program_id(0)                    # 0 = stats pass, 1 = apply pass
        n = pl.program_id(1)                    # batch image
        m = pl.program_id(2)                    # pixel tile within the image
        step = n * n_m + m                      # flat tile id (also the stash slot)

        @pl.when((p == 0) & (step == 0))
        def _init():
            sum_ref[...] = jnp.zeros_like(sum_ref)
            sq_ref[...] = jnp.zeros_like(sq_ref)

        def compute_z():
            x = jnp.maximum(p_ref[...], 0)      # fused pre-conv ReLU (bf16)
            z = jnp.dot(w_ref[...], x, preferred_element_type=jnp.float32)  # (Cp_w, tm)
            return z[:Cp_o]                     # drop weight-only channel padding

        @pl.when(p == 0)                        # accumulate batch statistics
        def _stats():
            z = compute_z()
            sum_ref[...] += jnp.sum(z, axis=1, keepdims=True)
            sq_ref[...] += jnp.sum(z * z, axis=1, keepdims=True)
            if use_stash:
                z_stash[step] = z

        @pl.when((p == 1) & (step == 0))        # finalize BN scale/shift once
        def _finalize():
            mean = sum_ref[...] * inv_m
            var = jnp.maximum(sq_ref[...] * inv_m - mean * mean, 0.0)  # clamp cancellation
            inv_std = jax.lax.rsqrt(var + eps_f)
            scale = g_ref[...] * inv_std
            scale_ref[...] = scale
            shift_ref[...] = b_ref[...] - mean * scale

        @pl.when(p == 1)                        # apply BN, lane-dense (C_out, tm) store
        def _apply():
            z = z_stash[step] if use_stash else compute_z()
            o_ref[...] = z * scale_ref[...] + shift_ref[...]

    # Patches: re-read in pass 1 only on the recompute fallback.  With the stash, the
    # pass-1 index is pinned at the last pass-0 block so no patch DMA is issued.
    if use_stash:
        patch_idx = lambda p, n, m: (n * (1 - p) + (N - 1) * p, 0,
                                     m * (1 - p) + (n_m - 1) * p)
    else:
        patch_idx = lambda p, n, m: (n, 0, m)

    # Output block stays pinned at (0,0,0) for the whole stats pass (never written, so
    # nothing is flushed), then tracks (n, m) during the apply pass where it is fully
    # overwritten.  Even a spurious boundary flush would be overwritten by the pass-1
    # write of the same block, so this does not rely on fragile revisit semantics.
    out_idx = lambda p, n, m: (n * p, 0, m * p)

    scratch_shapes = [
        pltpu.VMEM((Cp_o, 1), jnp.float32),     # per-channel sum
        pltpu.VMEM((Cp_o, 1), jnp.float32),     # per-channel sum of squares
        pltpu.VMEM((Cp_o, 1), jnp.float32),     # BN scale
        pltpu.VMEM((Cp_o, 1), jnp.float32),     # BN shift
    ]
    if use_stash:
        scratch_shapes.append(pltpu.VMEM((N * n_m, Cp_o, tm), jnp.float32))  # z stash

    out_p = pl.pallas_call(
        kernel,
        out_shape=jax.ShapeDtypeStruct((N, Cp_o, HoWop), jnp.float32),
        grid_spec=pltpu.PrefetchScalarGridSpec(
            num_scalar_prefetch=0,
            grid=(2, N, n_m),
            in_specs=[
                pl.BlockSpec((None, Kp, tm), patch_idx),            # patches^T tiles
                pl.BlockSpec((Cp_w, Kp), lambda p, n, m: (0, 0)),   # weights, resident
                pl.BlockSpec((Cp_o, 1), lambda p, n, m: (0, 0)),    # gamma column
                pl.BlockSpec((Cp_o, 1), lambda p, n, m: (0, 0)),    # beta column
            ],
            out_specs=pl.BlockSpec((None, Cp_o, tm), out_idx),
            scratch_shapes=scratch_shapes,
        ),
        compiler_params=pltpu.CompilerParams(
            dimension_semantics=("arbitrary", "arbitrary", "arbitrary"),
            vmem_limit_bytes=vmem_limit,
        ),
    )(patches_t, w_t, gamma_c, beta_c)

    # (N, Cp_o, HoWop) -> (N, C_out, Ho, Wo): slice is a no-op when no padding was
    # added, and the reshape is layout-free.  No transpose needed.
    return out_p[:, :C_out, :HoWo].reshape(N, C_out, Ho, Wo)


# ------------------------------ reference (JAX) ------------------------------

def _reference(x_nchw, conv_w, gamma, beta, stride, padding, eps, compute_dtype):
    y = jnp.maximum(x_nchw, 0.0).astype(compute_dtype)
    z = jax.lax.conv_general_dilated(
        y, conv_w.astype(compute_dtype),
        window_strides=(stride, stride),
        padding=[(padding, padding), (padding, padding)],
        dimension_numbers=("NCHW", "OIHW", "NCHW"),
        preferred_element_type=jnp.float32,
    )
    mean = jnp.mean(z, axis=(0, 2, 3), keepdims=True)
    var = jnp.mean((z - mean) ** 2, axis=(0, 2, 3), keepdims=True)
    zhat = (z - mean) * jax.lax.rsqrt(var + eps)
    return zhat * gamma.reshape(1, -1, 1, 1) + beta.reshape(1, -1, 1, 1)


# ---------------------------------- main --------------------------------------

if __name__ == "__main__":
    # DARTS-style config: C_in=4, C_out=8, kernel 3x3, stride 1, pad 1.
    N, C_in, H, W = 2, 4, 16, 16
    C_out, KH, KW = 8, 3, 3
    stride, padding = 1, 1

    key = jax.random.PRNGKey(0)
    kx, kw, kg, kb = jax.random.split(key, 4)
    x = jax.random.normal(kx, (N, C_in, H, W), dtype=jnp.float32)
    conv_w = 0.1 * jax.random.normal(kw, (C_out, C_in, KH, KW), dtype=jnp.float32)
    gamma = 1.0 + 0.1 * jax.random.normal(kg, (C_out,), dtype=jnp.float32)
    beta = 0.1 * jax.random.normal(kb, (C_out,), dtype=jnp.float32)

    out = relu_conv_bn(x, conv_w, gamma, beta, stride=stride, padding=padding)
    out = jax.block_until_ready(out)

    # Kernel-math check against a reference using the same bf16 operand quantization.
    ref_bf16 = _reference(x, conv_w, gamma, beta, stride, padding, 1e-5, jnp.bfloat16)
    np.testing.assert_allclose(np.asarray(out), np.asarray(ref_bf16),
                               rtol=2e-3, atol=2e-3)

    # Module-semantics sanity check against a pure-f32 reference (bf16 MXU operands
    # introduce only small deviations; BN output is ~unit scale so atol is meaningful).
    ref_f32 = _reference(x, conv_w, gamma, beta, stride, padding, 1e-5, jnp.float32)
    np.testing.assert_allclose(np.asarray(out), np.asarray(ref_f32),
                               rtol=0.0, atol=5e-2)

    print("KERNEL_OK")
</pallas_src>

<mosaic_0001>
module attributes {stable_mosaic.version = 11 : i64} {
  func.func @kernel(%arg0: i32, %arg1: i32, %arg2: i32, %arg3: memref<1x48x256xbf16, #tpu.memory_space<vmem>>, %arg4: memref<16x48xbf16, #tpu.memory_space<vmem>>, %arg5: memref<8x1xf32, #tpu.memory_space<vmem>>, %arg6: memref<8x1xf32, #tpu.memory_space<vmem>>, %arg7: memref<1x8x256xf32, #tpu.memory_space<vmem>>, %arg8: memref<8x1xf32, #tpu.memory_space<vmem>>, %arg9: memref<8x1xf32, #tpu.memory_space<vmem>>, %arg10: memref<8x1xf32, #tpu.memory_space<vmem>>, %arg11: memref<8x1xf32, #tpu.memory_space<vmem>>, %arg12: memref<2x8x256xf32, #tpu.memory_space<vmem>>) attributes {dimension_semantics = [#tpu.dimension_semantics<arbitrary>, #tpu.dimension_semantics<arbitrary>, #tpu.dimension_semantics<arbitrary>], iteration_bounds = array<i64: 2, 2, 1>, scalar_prefetch = 0 : i64, scratch_operands = 5 : i64, tpu.core_type = #tpu.core_type<tc>, window_params = [{transform_indices = @transform_0, window_bounds = array<i64: 1, 48, 256>}, {pipeline_mode = #tpu.pipeline_mode<synchronous>, transform_indices = @transform_1, window_bounds = array<i64: 16, 48>}, {pipeline_mode = #tpu.pipeline_mode<synchronous>, transform_indices = @transform_2, window_bounds = array<i64: 8, 1>}, {pipeline_mode = #tpu.pipeline_mode<synchronous>, transform_indices = @transform_3, window_bounds = array<i64: 8, 1>}, {transform_indices = @transform_4, window_bounds = array<i64: 1, 8, 256>}]} {
    %c1_i32 = arith.constant 1 : i32
    %0 = arith.muli %arg1, %c1_i32 : i32
    %1 = arith.addi %0, %arg2 : i32
    %c0_i32 = arith.constant 0 : i32
    %2 = arith.cmpi eq, %arg0, %c0_i32 : i32
    %c0_i32_0 = arith.constant 0 : i32
    %3 = arith.cmpi eq, %1, %c0_i32_0 : i32
    %4 = arith.andi %2, %3 : i1
    %5 = arith.extui %4 : i1 to i32
    %c0_i32_1 = arith.constant 0 : i32
    %6 = arith.cmpi ne, %5, %c0_i32_1 : i32
    scf.if %6 {
      %cst = arith.constant 0.000000e+00 : f32
      %18 = vector.broadcast %cst : f32 to vector<8x1xf32>
      %c0 = arith.constant 0 : index
      %c0_9 = arith.constant 0 : index
      %19 = vector.load %arg8[%c0, %c0_9] : memref<8x1xf32, #tpu.memory_space<vmem>>, vector<8x1xf32>
      tpu.vector_store %arg8[%c0, %c0_9], %18 {strides = array<i32>} : memref<8x1xf32, #tpu.memory_space<vmem>>, vector<8x1xf32>,
      %cst_10 = arith.constant 0.000000e+00 : f32
      %20 = vector.broadcast %cst_10 : f32 to vector<8x1xf32>
      %c0_11 = arith.constant 0 : index
      %c0_12 = arith.constant 0 : index
      %21 = vector.load %arg9[%c0_11, %c0_12] : memref<8x1xf32, #tpu.memory_space<vmem>>, vector<8x1xf32>
      tpu.vector_store %arg9[%c0_11, %c0_12], %20 {strides = array<i32>} : memref<8x1xf32, #tpu.memory_space<vmem>>, vector<8x1xf32>,
    } else {
    }
    %c0_i32_2 = arith.constant 0 : i32
    %7 = arith.cmpi eq, %arg0, %c0_i32_2 : i32
    %8 = arith.extui %7 : i1 to i32
    %c0_i32_3 = arith.constant 0 : i32
    %9 = arith.cmpi ne, %8, %c0_i32_3 : i32
    scf.if %9 {
      %c0 = arith.constant 0 : index
      %c0_9 = arith.constant 0 : index
      %c0_10 = arith.constant 0 : index
      %18 = vector.load %arg3[%c0, %c0_9, %c0_10] : memref<1x48x256xbf16, #tpu.memory_space<vmem>>, vector<1x48x256xbf16>
      %19 = vector.shape_cast %18 : vector<1x48x256xbf16> to vector<48x256xbf16>
      %cst = arith.constant 0.000000e+00 : bf16
      %20 = vector.broadcast %cst : bf16 to vector<48x256xbf16>
      %21 = arith.maximumf %19, %20 : vector<48x256xbf16>
      %c0_11 = arith.constant 0 : index
      %c0_12 = arith.constant 0 : index
      %22 = vector.load %arg4[%c0_11, %c0_12] : memref<16x48xbf16, #tpu.memory_space<vmem>>, vector<16x48xbf16>
      %cst_13 = arith.constant dense<0.000000e+00> : vector<16x256xf32>
      %23 = tpu.matmul %22, %21, %cst_13 {dimension_numbers = #tpu.dot_dimension_numbers<[1], [0], [0], [1], [0, 0, 1, 1], [], []>} : vector<16x48xbf16>, vector<48x256xbf16>, vector<16x256xf32> -> vector<16x256xf32>
      %24 = vector.extract_strided_slice %23 {offsets = [0, 0], sizes = [8, 256], strides = [1, 1]} : vector<16x256xf32> to vector<8x256xf32>
      %c0_14 = arith.constant 0 : index
      %c0_15 = arith.constant 0 : index
      %25 = vector.load %arg8[%c0_14, %c0_15] : memref<8x1xf32, #tpu.memory_space<vmem>>, vector<8x1xf32>
      %cst_16 = arith.constant dense<0.000000e+00> : vector<8xf32>
      %26 = vector.multi_reduction <add>, %24, %cst_16 [1] : vector<8x256xf32> to vector<8xf32>
      %27 = vector.shape_cast %26 : vector<8xf32> to vector<8x1xf32>
      %28 = arith.addf %25, %27 : vector<8x1xf32>
      %c0_17 = arith.constant 0 : index
      %c0_18 = arith.constant 0 : index
      %29 = vector.load %arg8[%c0_17, %c0_18] : memref<8x1xf32, #tpu.memory_space<vmem>>, vector<8x1xf32>
      tpu.vector_store %arg8[%c0_17, %c0_18], %28 {strides = array<i32>} : memref<8x1xf32, #tpu.memory_space<vmem>>, vector<8x1xf32>,
      %c0_19 = arith.constant 0 : index
      %c0_20 = arith.constant 0 : index
      %30 = vector.load %arg9[%c0_19, %c0_20] : memref<8x1xf32, #tpu.memory_space<vmem>>, vector<8x1xf32>
      %31 = arith.mulf %24, %24 : vector<8x256xf32>
      %cst_21 = arith.constant dense<0.000000e+00> : vector<8xf32>
      %32 = vector.multi_reduction <add>, %31, %cst_21 [1] : vector<8x256xf32> to vector<8xf32>
      %33 = vector.shape_cast %32 : vector<8xf32> to vector<8x1xf32>
      %34 = arith.addf %30, %33 : vector<8x1xf32>
      %c0_22 = arith.constant 0 : index
      %c0_23 = arith.constant 0 : index
      %35 = vector.load %arg9[%c0_22, %c0_23] : memref<8x1xf32, #tpu.memory_space<vmem>>, vector<8x1xf32>
      tpu.vector_store %arg9[%c0_22, %c0_23], %34 {strides = array<i32>} : memref<8x1xf32, #tpu.memory_space<vmem>>, vector<8x1xf32>,
      %36 = arith.index_cast %1 : i32 to index
      %c0_24 = arith.constant 0 : index
      %c0_25 = arith.constant 0 : index
      %37 = vector.load %arg12[%36, %c0_24, %c0_25] : memref<2x8x256xf32, #tpu.memory_space<vmem>>, vector<1x8x256xf32>
      %38 = vector.shape_cast %37 : vector<1x8x256xf32> to vector<8x256xf32>
      %39 = vector.shape_cast %24 : vector<8x256xf32> to vector<1x8x256xf32>
      tpu.vector_store %arg12[%36, %c0_24, %c0_25], %39 {strides = array<i32>} : memref<2x8x256xf32, #tpu.memory_space<vmem>>, vector<1x8x256xf32>,
    } else {
    }
    %c1_i32_4 = arith.constant 1 : i32
    %10 = arith.cmpi eq, %arg0, %c1_i32_4 : i32
    %c0_i32_5 = arith.constant 0 : i32
    %11 = arith.cmpi eq, %1, %c0_i32_5 : i32
    %12 = arith.andi %10, %11 : i1
    %13 = arith.extui %12 : i1 to i32
    %c0_i32_6 = arith.constant 0 : i32
    %14 = arith.cmpi ne, %13, %c0_i32_6 : i32
    scf.if %14 {
      %c0 = arith.constant 0 : index
      %c0_9 = arith.constant 0 : index
      %18 = vector.load %arg8[%c0, %c0_9] : memref<8x1xf32, #tpu.memory_space<vmem>>, vector<8x1xf32>
      %cst = arith.constant 0.001953125 : f32
      %19 = vector.broadcast %cst : f32 to vector<8x1xf32>
      %20 = arith.mulf %18, %19 : vector<8x1xf32>
      %c0_10 = arith.constant 0 : index
      %c0_11 = arith.constant 0 : index
      %21 = vector.load %arg9[%c0_10, %c0_11] : memref<8x1xf32, #tpu.memory_space<vmem>>, vector<8x1xf32>
      %cst_12 = arith.constant 0.001953125 : f32
      %22 = vector.broadcast %cst_12 : f32 to vector<8x1xf32>
      %23 = arith.mulf %21, %22 : vector<8x1xf32>
      %24 = arith.mulf %20, %20 : vector<8x1xf32>
      %25 = arith.subf %23, %24 : vector<8x1xf32>
      %cst_13 = arith.constant 0.000000e+00 : f32
      %26 = vector.broadcast %cst_13 : f32 to vector<8x1xf32>
      %27 = arith.maximumf %25, %26 : vector<8x1xf32>
      %cst_14 = arith.constant 9.99999974E-6 : f32
      %28 = vector.broadcast %cst_14 : f32 to vector<8x1xf32>
      %29 = arith.addf %27, %28 : vector<8x1xf32>
      %30 = math.rsqrt %29 : vector<8x1xf32>
      %c0_15 = arith.constant 0 : index
      %c0_16 = arith.constant 0 : index
      %31 = vector.load %arg5[%c0_15, %c0_16] : memref<8x1xf32, #tpu.memory_space<vmem>>, vector<8x1xf32>
      %32 = arith.mulf %31, %30 : vector<8x1xf32>
      %c0_17 = arith.constant 0 : index
      %c0_18 = arith.constant 0 : index
      %33 = vector.load %arg10[%c0_17, %c0_18] : memref<8x1xf32, #tpu.memory_space<vmem>>, vector<8x1xf32>
      tpu.vector_store %arg10[%c0_17, %c0_18], %32 {strides = array<i32>} : memref<8x1xf32, #tpu.memory_space<vmem>>, vector<8x1xf32>,
      %c0_19 = arith.constant 0 : index
      %c0_20 = arith.constant 0 : index
      %34 = vector.load %arg6[%c0_19, %c0_20] : memref<8x1xf32, #tpu.memory_space<vmem>>, vector<8x1xf32>
      %35 = arith.mulf %20, %32 : vector<8x1xf32>
      %36 = arith.subf %34, %35 : vector<8x1xf32>
      %c0_21 = arith.constant 0 : index
      %c0_22 = arith.constant 0 : index
      %37 = vector.load %arg11[%c0_21, %c0_22] : memref<8x1xf32, #tpu.memory_space<vmem>>, vector<8x1xf32>
      tpu.vector_store %arg11[%c0_21, %c0_22], %36 {strides = array<i32>} : memref<8x1xf32, #tpu.memory_space<vmem>>, vector<8x1xf32>,
    } else {
    }
    %c1_i32_7 = arith.constant 1 : i32
    %15 = arith.cmpi eq, %arg0, %c1_i32_7 : i32
    %16 = arith.extui %15 : i1 to i32
    %c0_i32_8 = arith.constant 0 : i32
    %17 = arith.cmpi ne, %16, %c0_i32_8 : i32
    scf.if %17 {
      %18 = arith.index_cast %1 : i32 to index
      %c0 = arith.constant 0 : index
      %c0_9 = arith.constant 0 : index
      %19 = vector.load %arg12[%18, %c0, %c0_9] : memref<2x8x256xf32, #tpu.memory_space<vmem>>, vector<1x8x256xf32>
      %20 = vector.shape_cast %19 : vector<1x8x256xf32> to vector<8x256xf32>
      %c0_10 = arith.constant 0 : index
      %c0_11 = arith.constant 0 : index
      %21 = vector.load %arg10[%c0_10, %c0_11] : memref<8x1xf32, #tpu.memory_space<vmem>>, vector<8x1xf32>
      %22 = vector.broadcast %21 : vector<8x1xf32> to vector<8x256xf32>
      %23 = arith.mulf %20, %22 : vector<8x256xf32>
      %c0_12 = arith.constant 0 : index
      %c0_13 = arith.constant 0 : index
      %24 = vector.load %arg11[%c0_12, %c0_13] : memref<8x1xf32, #tpu.memory_space<vmem>>, vector<8x1xf32>
      %25 = vector.broadcast %24 : vector<8x1xf32> to vector<8x256xf32>
      %26 = arith.addf %23, %25 : vector<8x256xf32>
      %c0_14 = arith.constant 0 : index
      %c0_15 = arith.constant 0 : index
      %c0_16 = arith.constant 0 : index
      %27 = vector.load %arg7[%c0_14, %c0_15, %c0_16] : memref<1x8x256xf32, #tpu.memory_space<vmem>>, vector<1x8x256xf32>
      %28 = vector.shape_cast %27 : vector<1x8x256xf32> to vector<8x256xf32>
      %29 = vector.shape_cast %26 : vector<8x256xf32> to vector<1x8x256xf32>
      tpu.vector_store %arg7[%c0_14, %c0_15, %c0_16], %29 {strides = array<i32>} : memref<1x8x256xf32, #tpu.memory_space<vmem>>, vector<1x8x256xf32>,
    } else {
    }
    return
  }
  func.func @transform_0(%arg0: i32, %arg1: i32, %arg2: i32) -> (i32, i32, i32) {
    %c1_i32 = arith.constant 1 : i32
    %0 = arith.subi %c1_i32, %arg0 : i32
    %1 = arith.muli %arg1, %0 : i32
    %c1_i32_0 = arith.constant 1 : i32
    %2 = arith.muli %c1_i32_0, %arg0 : i32
    %3 = arith.addi %1, %2 : i32
    %c1_i32_1 = arith.constant 1 : i32
    %4 = arith.subi %c1_i32_1, %arg0 : i32
    %5 = arith.muli %arg2, %4 : i32
    %c0_i32 = arith.constant 0 : i32
    %6 = arith.muli %c0_i32, %arg0 : i32
    %7 = arith.addi %5, %6 : i32
    %c0_i32_2 = arith.constant 0 : i32
    %c0_i32_3 = arith.constant 0 : i32
    return %3, %c0_i32_2, %7 : i32, i32, i32
  }
  func.func @transform_1(%arg0: i32, %arg1: i32, %arg2: i32) -> (i32, i32) {
    %c0_i32 = arith.constant 0 : i32
    %c0_i32_0 = arith.constant 0 : i32
    %c0_i32_1 = arith.constant 0 : i32
    return %c0_i32, %c0_i32_0 : i32, i32
  }
  func.func @transform_2(%arg0: i32, %arg1: i32, %arg2: i32) -> (i32, i32) {
    %c0_i32 = arith.constant 0 : i32
    %c0_i32_0 = arith.constant 0 : i32
    %c0_i32_1 = arith.constant 0 : i32
    return %c0_i32, %c0_i32_0 : i32, i32
  }
  func.func @transform_3(%arg0: i32, %arg1: i32, %arg2: i32) -> (i32, i32) {
    %c0_i32 = arith.constant 0 : i32
    %c0_i32_0 = arith.constant 0 : i32
    %c0_i32_1 = arith.constant 0 : i32
    return %c0_i32, %c0_i32_0 : i32, i32
  }
  func.func @transform_4(%arg0: i32, %arg1: i32, %arg2: i32) -> (i32, i32, i32) {
    %0 = arith.muli %arg1, %arg0 : i32
    %1 = arith.muli %arg2, %arg0 : i32
    %c0_i32 = arith.constant 0 : i32
    %c0_i32_0 = arith.constant 0 : i32
    return %0, %c0_i32, %1 : i32, i32, i32
  }
}

</mosaic_0001>

<bundles_post_ra>
// kernel: relu_conv_bn.1
= control target key start
LH: loop header
LB: loop body
LE: loop exit
PB: predicated region body
PF: predicated region fallthrough
CT: control target
= control target key end

     0   :  { %s690_s15 = smov 0   ;;  %s692_s16 = smov 0   ;;  %s774_s0 = inlined_call_operand.vmem [shape: bf16[2,48,256], index: 0, kind: input, shape index: {}]   ;;  %s775_s1 = inlined_call_operand.vmem [shape: bf16[16,48], index: 1, kind: input, shape index: {}]   ;;  %s776_s2 = inlined_call_operand.vmem [shape: f32[8,1], index: 2, kind: input, shape index: {}]   ;;  %s777_s3 = inlined_call_operand.vmem [shape: f32[8,1], index: 3, kind: input, shape index: {}]   ;;  %s778_s4 = inlined_call_operand.vmem [shape: f32[2,8,256], index: 4, kind: output, shape index: {}]  }
   0x1   :  { %s694_s17 = smov 0   ;;  %s696_s18 = smov 0  }
   0x2   :  { %s698_s19 = smov 0  }
   0x3 LB: > { %s29_s20 = sadd.s32 1, %s653_s17  ;;  %s33_s21 = sadd.s32 1, %s657_s18  ;;  %s661_s19 = sphi %s698_s19, %s14_s19   ;;  %s657_s18 = sphi %s696_s18, %s782_s18   ;;  %s653_s17 = sphi %s694_s17, %s781_s17   ;;  %s649_s16 = sphi %s692_s16, %s780_s16   ;;  %s645_s15 = sphi %s690_s15, %s779_s15  }
   0x4   : > { %p31_p0 = scmp.ge.s32.totalorder %s29_s20, 2  ;;  %p555_p1 = scmp.ge.s32.totalorder %s661_s19, 1 }
   0x5   : > { %p210_p2 = scmp.lt.s32.totalorder %s661_s19, 5 }
   0x6   : > { %s784_s20 = smov (%p31_p0, %s29_s20), 0  ;;  %s786_s21 = smov (!%p31_p0, %s33_s21), %s657_s18 }
   0x7   : > { %p211_p3 = pnand %p555_p1, %p210_p2  ;;  %p35_p4 = scmp.ge.s32.totalorder %s786_s21, 2 }
   0x8   : > { %s250_s22 = ssub.s32 (!%p211_p3), 1, %s649_s16  ;;  %s268_s23 = smul.u32 (!%p211_p3), %s645_s15, %s649_s16 }
   0x9   : > { %s788_s21 = smov (%p35_p4, %s786_s21), 0  ;;  %214 = sbr.rel (%p211_p3) target bundleno = 486 (0x1e6), region = 36 }
   0xa   : > { %s251_s24 = smul.u32 (!%p211_p3), %s645_s15, %s250_s22  ;;  %p284_p5 = scmp.eq.s32.totalorder (!%p211_p3), %s649_s16, 0 }
   0xb   : > { %p271_p6 = scmp.lt.s32.totalorder (!%p211_p3), %s268_s23, 1  ;;  %p285_p7 = scmp.eq.s32.totalorder (!%p211_p3), %s645_s15, 0 }
   0xc   : > { %s252_s25 = sadd.s32 (!%p211_p3), %s649_s16, %s251_s24 }
   0xd   : > { %p255_p8 = scmp.lt.s32.totalorder (!%p211_p3), %s252_s25, 1  ;;  %p286_p9 = pnand (!%p211_p3), %p285_p7, %p284_p5 }
   0xe   : > { %s790_s23 = smov (!%p271_p6, %s268_s23), 1 }
   0xf   : > { %s792_s25 = smov (!%p255_p8, %s252_s25), 1  ;;  %s573_s26 = sshll.u32 %s790_s23, 4 }
  0x10   : > { %s577_s27 = smul.u32 48, %s792_s25  ;;  %s736_s30 = scalar_lea.vmem %s778_s4, %s573_s26 }
  0x11   : > { %289 = sbr.rel (%p286_p9) target bundleno = 25 (0x19), region = 40 }
  0x12   : > { %s262_s7 = scalar_lea.vmem %s774_s0, %s577_s27 }
  0x16   : > { %vm290_vm0 = vcmask 7168   ;;  %v663_v0 = vmov 0.0  }
  0x17   : > { %291 = vst.msk [vmem:[#allocation2] sm:$0xff] %vm290_vm0, %v663_v0 }
  0x18   : > { %292 = vst.msk [vmem:[#allocation3] sm:$0xff] %vm290_vm0, %v663_v0 }
  0x19 PF: > { %p559_p10 = scmp.ne.s32.totalorder %s649_s16, 0 }
  0x1a   : > { %s575_s10 = sshll.u32 (!%p559_p10), %s645_s15, 4 }
  0x1b   : > { %295 = sbr.rel (%p559_p10) target bundleno = 305 (0x131), region = 44  ;;  %s386_s11 = scalar_lea.vmem (!%p559_p10), [#allocation6], %s575_s10 }
  0x20   : > { %v300_v1 = vld [vmem:[%s262_s7 + $0x20] sm:$0xff]  ;;  %v301_v2 = vld [vmem:[%s262_s7 + $0x28] sm:$0xff]  ;;  %v298_v3 = vld [vmem:[%s262_s7 + $0x10] sm:$0xff]  ;;  %vm339_vm1 = vcmask 392192   ;;  %vm374_vm2 = vcmask 7168  }
  0x21   : > { %v310_v4 = vunpack.c.l.bf16 %v300_v1  ;;  %v312_v5 = vunpack.c.l.bf16 %v301_v2  ;;  %v311_v6 = vunpack.c.h.bf16 %v300_v1  ;;  %v313_v7 = vunpack.c.h.bf16 %v301_v2  ;;  %v299_v8 = vld [vmem:[%s262_s7 + $0x18] sm:$0xff]  ;;  %v296_v13 = vld [vmem:[%s262_s7] sm:$0xff]  ;;  %v297_v14 = vld [vmem:[%s262_s7 + $0x8] sm:$0xff] }
  0x22   : > { %v306_v9 = vunpack.c.l.bf16 %v298_v3  ;;  %v308_v10 = vunpack.c.l.bf16 %v299_v8  ;;  %v307_v11 = vunpack.c.h.bf16 %v298_v3  ;;  %v309_v12 = vunpack.c.h.bf16 %v299_v8  ;;  %v574_v37 = vld [vmem:[%s775_s1] sm:$0xff]  ;;  %v376_v49 = vld [vmem:[#allocation3] sm:$0xff] }
  0x23   : > { %v322_v15 = vmax.f32 %v310_v4, 0.0  ;;  %v324_v16 = vmax.f32 %v312_v5, 0.0  ;;  %v323_v17 = vmax.f32 %v311_v6, 0.0  ;;  %v325_v18 = vmax.f32 %v313_v7, 0.0  ;;  %v369_v46 = vld [vmem:[#allocation2] sm:$0xff] }
  0x24   : > { %v318_v19 = vmax.f32 %v306_v9, 0.0  ;;  %v320_v20 = vmax.f32 %v308_v10, 0.0  ;;  %v319_v21 = vmax.f32 %v307_v11, 0.0  ;;  %v321_v22 = vmax.f32 %v309_v12, 0.0 }
  0x25   : > { %v330_v23 = vpack.c.bf16 %v324_v16, %v322_v15  ;;  %v331_v24 = vpack.c.bf16 %v325_v18, %v323_v17  ;;  %v302_v25 = vunpack.c.l.bf16 %v296_v13  ;;  %v304_v26 = vunpack.c.l.bf16 %v297_v14 }
  0x26   : > { %v303_v27 = vunpack.c.h.bf16 %v296_v13  ;;  %v305_v28 = vunpack.c.h.bf16 %v297_v14  ;;  %v328_v29 = vpack.c.bf16 %v320_v20, %v318_v19  ;;  %v329_v30 = vpack.c.bf16 %v321_v22, %v319_v21 }
  0x27   : > { %348 = vmatpush.bf16.msra.mxu0 %v330_v23  ;;  %361 = vmatpush.bf16.msra.mxu1 %v331_v24  ;;  %v314_v31 = vmax.f32 %v302_v25, 0.0  ;;  %v316_v32 = vmax.f32 %v304_v26, 0.0 }
  0x28   : > { %v315_v33 = vmax.f32 %v303_v27, 0.0  ;;  %v317_v34 = vmax.f32 %v305_v28, 0.0 }
  0x29   : > { %v326_v35 = vpack.c.bf16 %v316_v32, %v314_v31 }
  0x2a   : > { %v327_v36 = vpack.c.bf16 %v317_v34, %v315_v33 }
  0x2b   : > { %349 = vmatpush.bf16.msra.mxu0 %v328_v29  ;;  %362 = vmatpush.bf16.msra.mxu1 %v329_v30 }
  0x2f   : > { %350 = vmatpush.bf16.msra.mxu0 %v326_v35  ;;  %363 = vmatpush.bf16.msra.mxu1 %v327_v36 }
  0x32   : > { %564 = vmatmul.msk.bf16.vlgmr.msra.gmra.mxu0 %vm339_vm1, %v574_v37  ;;  %565 = vmatmul.msk.bf16.vlgmr.msra.gmra.mxu1 %vm339_vm1, %v574_v37 }
  0xaf   : > { %v352_v38 = vpop.f32.mrf.mxu0  ;;  %v365_v39 = vpop.f32.mrf.mxu1 }
  0xb0   : > { %387 = vst [vmem:[%s386_s11] sm:$0xff] %v352_v38  ;;  %v370_v40 = vadd.f32 %v365_v39, %v352_v38  ;;  %v377_v41 = vmul.f32 %v352_v38, %v352_v38  ;;  %v378_v42 = vmul.f32 %v365_v39, %v365_v39 }
  0xb1   : > { %388 = vst [vmem:[%s386_s11 + $0x8] sm:$0xff] %v365_v39 }
  0xb2   : > { %371 = vadd.xlane.f32.xlu0 %v370_v40  ;;  %v379_v45 = vadd.f32 %v378_v42, %v377_v41 }
  0xb7   : > { %v354_v43 = vpop.f32.mrf.mxu0  ;;  %v367_v44 = vpop.f32.mrf.mxu1 }
  0xba   : > { %380 = vadd.xlane.f32.xlu0 %v379_v45 }
 0x125   : > { %v372_v47 = vpop.xlane.xlu0 %371 }
 0x126   : > { %v373_v48 = vadd.f32 %v372_v47, %v369_v46 }
 0x128   : > { %375 = vst.msk [vmem:[#allocation2] sm:$0xff] %vm374_vm2, %v373_v48 }
 0x12d   : > { %v381_v50 = vpop.xlane.xlu0 %380 }
 0x12e   : > { %v382_v51 = vadd.f32 %v381_v50, %v376_v49 }
 0x130   : > { %383 = vst.msk [vmem:[#allocation3] sm:$0xff] %vm374_vm2, %v382_v51 }
 0x131 PF: > { %p389_p11 = scmp.eq.s32.totalorder %s649_s16, 1 }
 0x133   : > { %p390_p12 = pnand %p389_p11, %p285_p7 }
 0x135   : > { %393 = sbr.rel (%p390_p12) target bundleno = 350 (0x15e), region = 48 }
 0x13a   : > { %v394_v52 = vld [vmem:[#allocation2] sm:$0xff]  ;;  %v396_v53 = vld [vmem:[#allocation3] sm:$0xff]  ;;  %vm414_vm6 = vcmask 7168  }
 0x13b   : > { %v395_v54 = vmul.f32 0.001953125, %v394_v52  ;;  %v397_v55 = vmul.f32 0.001953125, %v396_v53  ;;  %v412_v2 = vld [vmem:[%s776_s2] sm:$0xff] }
 0x13c   : > { %v416_v5 = vld [vmem:[%s777_s3] sm:$0xff] }
 0x13d   : > { %v398_v56 = vmul.f32 %v395_v54, %v395_v54 }
 0x13f   : > { %v399_v57 = vsub.f32 %v397_v55, %v398_v56 }
 0x141   : > { %v400_v58 = vmax.f32 %v399_v57, 0.0 }
 0x143   : > { %v401_v59 = vadd.f32 1e-05, %v400_v58 }
 0x145   : > { %620 = vrsqrt.f32 %v401_v59  ;;  %vm408_vm3 = vweird.f32 %v401_v59 }
 0x14b   : > { %v621_v60 = vpop.eup %620 }
 0x14c   : > { %v403_v61 = vmul.f32 %v621_v60, %v401_v59  ;;  %vm409_vm4 = vweird.f32 %v621_v60 }
 0x14d   : > { %vm410_vm5 = vmor %vm408_vm3, %vm409_vm4 }
 0x14e   : > { %v404_v62 = vmul.f32 %v621_v60, %v403_v61 }
 0x150   : > { %v405_v63 = vmul.f32 0.5, %v404_v62 }
 0x152   : > { %v406_v0 = vsub.f32 1.5, %v405_v63 }
 0x154   : > { %v407_v1 = vmul.f32 %v621_v60, %v406_v0 }
 0x156   : > { %v411_v3 = vsel %vm410_vm5, %v621_v60, %v407_v1 }
 0x157   : > { %v413_v4 = vmul.f32 %v412_v2, %v411_v3 }
 0x159   : > { %415 = vst.msk [vmem:[#allocation4] sm:$0xff] %vm414_vm6, %v413_v4  ;;  %v417_v6 = vmul.f32 %v413_v4, %v395_v54 }
 0x15b   : > { %v418_v7 = vsub.f32 %v416_v5, %v417_v6 }
 0x15d   : > { %419 = vst.msk [vmem:[#allocation5] sm:$0xff] %vm414_vm6, %v418_v7 }
 0x15e PF: > { %p568_p13 = scmp.ne.s32.totalorder %s649_s16, 1 }
 0x15f   : > { %s576_s23 = sshll.u32 (!%p568_p13), %s645_s15, 4 }
 0x160   : > { %422 = sbr.rel (%p568_p13) target bundleno = 486 (0x1e6), region = 52  ;;  %s425_s24 = scalar_lea.vmem (!%p568_p13), [#allocation6], %s576_s23 }
 0x165   : > { %v428_v8 = vld [vmem:[#allocation4] sm:$0xff]  ;;  %v664_v9 = vmov 0   ;;  %v436_v10 = vld [vmem:[#allocation5] sm:$0xff]  ;;  %v426_v12 = vld [vmem:[%s425_s24] sm:$0xff] }
 0x166   : > { %622 = vset.pattern.permute.xlu0 %v664_v9  ;;  %v427_v13 = vld [vmem:[%s425_s24 + $0x8] sm:$0xff] }
 0x167   : > { %431 = vperm.xlu0 %622, %v428_v8  }
 0x16f   : > { %439 = vperm.xlu0 %622, %v436_v10  }
 0x1d9   : > { %v432_v11 = vpop.permute.xlu0 %431 }
 0x1da   : > { %v434_v14 = vmul.f32 %v432_v11, %v426_v12  ;;  %v435_v15 = vmul.f32 %v432_v11, %v427_v13 }
 0x1e1   : > { %v440_v16 = vpop.permute.xlu0 %439 }
 0x1e2   : > { %v442_v17 = vadd.f32 %v440_v16, %v434_v14  ;;  %v443_v18 = vadd.f32 %v440_v16, %v435_v15 }
 0x1e4   : > { %444 = vst [vmem:[%s736_s30] sm:$0xff] %v442_v17 }
 0x1e5   : > { %445 = vst [vmem:[%s736_s30 + $0x8] sm:$0xff] %v443_v18 }
 0x1e6 PF: > { %s14_s19 = sadd.s32 1, %s661_s19   ;;  %s779_s15 = smov %s653_s17 }
 0x1e7   : > { %p11_p0 = scmp.ge.s32.totalorder %s14_s19, 6   ;;  %s780_s16 = smov %s657_s18 }
 0x1e8   : > { %s781_s17 = smov %s784_s20  ;;  %s782_s18 = smov %s788_s21 }
 0x1e9   :  { %13 = sbr.rel (!%p11_p0) target bundleno = 3 (0x3), region = 84 }

</bundles_post_ra>
